<compile_context>
chip_gen: v7x
topology: tpu7x:2x2x1
jax: 0.10.0
libtpu: 0.0.40
codegen_flags: <defaults>
</compile_context>

<pallas_src>
import functools

import jax
import jax.numpy as jnp
from jax.experimental import pallas as pl
from jax.experimental.pallas import tpu as pltpu


def _round_up(n, m):
    return ((n + m - 1) // m) * m


def _cdiv(a, b):
    return -(-a // b)


def _pick_tiling(B, tile_cap):
    """Pick (tile_b, Bp): tile is a multiple of 8 (f32 sublane), minimizes tail
    padding, and yields >=2 grid steps once the batch is big enough for two
    TensorCores (v7x) to both have real work."""
    Bp8 = _round_up(max(B, 8), 8)
    num_tiles = _cdiv(Bp8, tile_cap)
    if Bp8 >= 512:                       # give a second TC (v7x) real work
        num_tiles = max(num_tiles, 2)
    tile_b = _round_up(_cdiv(Bp8, num_tiles), 8)
    num_tiles = _cdiv(Bp8, tile_b)
    Bp = tile_b * num_tiles
    return tile_b, Bp


def critic_kernel(s_ref, a_ref, w1s_ref, w1a_ref, b1_ref,
                  w2_ref, b2_ref, w3_ref, b3_ref, o_ref):
    # s_ref: [TB, S] f32      a_ref: [TB, A] f32
    # w1s:   [S, F1] bf16     w1a:  [A, F1] bf16   b1: [1, F1] f32
    # w2:    [F1, F2] bf16    b2:   [1, F2] f32
    # w3:    [1, F2] f32      b3:   [1, 1]  f32
    # o_ref: [TB, 1] f32

    # In-kernel f32 -> bf16 cast (VPU, ~free); inputs arrive in f32 straight
    # from HBM so no separate XLA cast pass is needed.
    s = s_ref[...].astype(jnp.bfloat16)
    a = a_ref[...].astype(jnp.bfloat16)

    # Layer 1: fused concat -> two MXU dots (bf16 operands, f32 accumulate).
    h1 = (jnp.dot(s, w1s_ref[...], preferred_element_type=jnp.float32)
          + jnp.dot(a, w1a_ref[...], preferred_element_type=jnp.float32)
          + b1_ref[...])
    h1 = jnp.maximum(h1, 0.0).astype(jnp.bfloat16)            # relu(fc1(.))

    # Layer 2.
    h2 = jnp.dot(h1, w2_ref[...], preferred_element_type=jnp.float32) + b2_ref[...]
    h2 = jnp.maximum(h2, 0.0)                                  # relu(fc2(.))

    # Layer 3 (output width 1): VPU multiply + XLU lane reduction instead of an
    # N=1 MXU matmul.
    q = jnp.sum(h2 * w3_ref[...], axis=-1, keepdims=True) + b3_ref[...]
    o_ref[...] = q.astype(o_ref.dtype)                         # action_value(.)


@functools.partial(jax.jit, static_argnames=("tile_cap",))
def critic_forward(state, action, kparams, *, tile_cap=2048):
    B, S = state.shape
    A = action.shape[1]
    w1s, w1a, b1 = kparams["w1s"], kparams["w1a"], kparams["b1"]
    w2, b2 = kparams["w2"], kparams["b2"]
    w3, b3 = kparams["w3"], kparams["b3"]
    fc1p, fc2p = w1s.shape[1], w2.shape[1]

    tile_b, Bp = _pick_tiling(B, tile_cap)
    if Bp != B:   # ragged tail only; no-op for well-shaped batches
        state = jnp.pad(state, ((0, Bp - B), (0, 0)))
        action = jnp.pad(action, ((0, Bp - B), (0, 0)))

    grid = (Bp // tile_b,)

    def row_spec(d):                       # batch-tiled operands
        return pl.BlockSpec((tile_b, d), lambda i: (i, 0))

    def const_spec(r, c):                  # weights: same block every step -> VMEM-resident
        return pl.BlockSpec((r, c), lambda i: (0, 0))

    # VMEM budget: resident weights (x2 pipeline buffers) + double-buffered f32
    # I/O tiles + bf16/f32 intermediates, plus slack.
    weight_bytes = ((w1s.size + w1a.size + w2.size) * 2
                    + (b1.size + b2.size + w3.size + b3.size) * 4)
    io_tile_bytes = tile_b * (S + A + 1) * 4
    interm_bytes = tile_b * (fc1p + fc2p) * 6
    vmem_limit = int(min(2 * weight_bytes + 4 * io_tile_bytes + 2 * interm_bytes
                         + (4 << 20), 48 << 20))

    cost = pl.CostEstimate(
        flops=2 * Bp * (S * fc1p + A * fc1p + fc1p * fc2p + fc2p),
        transcendentals=0,
        bytes_accessed=Bp * (S + A) * 4 + weight_bytes + Bp * 4,
    )

    out = pl.pallas_call(
        critic_kernel,
        out_shape=jax.ShapeDtypeStruct((Bp, 1), jnp.float32),
        grid=grid,
        in_specs=[
            row_spec(S), row_spec(A),
            const_spec(S, fc1p), const_spec(A, fc1p), const_spec(1, fc1p),
            const_spec(fc1p, fc2p), const_spec(1, fc2p),
            const_spec(1, fc2p), const_spec(1, 1),
        ],
        out_specs=row_spec(1),
        compiler_params=pltpu.CompilerParams(
            dimension_semantics=("parallel",),   # shards batch steps across TCs on v7x
            vmem_limit_bytes=vmem_limit,
        ),
        cost_estimate=cost,
    )(state, action, w1s, w1a, b1, w2, b2, w3, b3)

    return out[:B]


def init_params(key, state_dims, action_dims, fc1_dims, fc2_dims):
    """Logical f32 params mimicking nn.Linear default init (U[-1/sqrt(fan_in), ..])."""
    def linear(k, fan_in, fan_out):
        kw, kb = jax.random.split(k)
        bound = 1.0 / jnp.sqrt(jnp.float32(fan_in))
        w = jax.random.uniform(kw, (fan_in, fan_out), jnp.float32, -bound, bound)
        b = jax.random.uniform(kb, (1, fan_out), jnp.float32, -bound, bound)
        return w, b

    k1, k2, k3 = jax.random.split(key, 3)
    w1, b1 = linear(k1, state_dims + action_dims, fc1_dims)
    w2, b2 = linear(k2, fc1_dims, fc2_dims)
    w3, b3 = linear(k3, fc2_dims, 1)
    return {"w1": w1, "b1": b1, "w2": w2, "b2": b2, "w3": w3, "b3": b3}


def prepare_kernel_params(params, state_dims, action_dims, lane=128):
    """Split w1 for the fused concat, zero-pad hidden dims to 128, cast matmul
    weights to bf16. Zero padding keeps the math bit-identical (relu(0)=0 feeds
    zero rows of the next layer)."""
    w1, b1 = params["w1"], params["b1"]
    w2, b2 = params["w2"], params["b2"]
    w3, b3 = params["w3"], params["b3"]
    fc1, fc2 = w1.shape[1], w2.shape[1]
    fc1p, fc2p = _round_up(fc1, lane), _round_up(fc2, lane)

    w1s = jnp.pad(w1[:state_dims], ((0, 0), (0, fc1p - fc1)))
    w1a = jnp.pad(w1[state_dims:], ((0, 0), (0, fc1p - fc1)))
    b1p = jnp.pad(b1, ((0, 0), (0, fc1p - fc1)))
    w2p = jnp.pad(w2, ((0, fc1p - fc1), (0, fc2p - fc2)))
    b2p = jnp.pad(b2, ((0, 0), (0, fc2p - fc2)))
    w3r = jnp.pad(w3.T, ((0, 0), (0, fc2p - fc2)))          # [1, fc2p], f32 (VPU path)

    return {
        "w1s": w1s.astype(jnp.bfloat16),
        "w1a": w1a.astype(jnp.bfloat16),
        "b1": b1p,
        "w2": w2p.astype(jnp.bfloat16),
        "b2": b2p,
        "w3": w3r,
        "b3": b3,
    }


def reference_forward_f32(state, action, params):
    """Pure-f32 module semantics (PyTorch forward)."""
    x = jnp.concatenate([state, action], axis=1)
    h1 = jax.nn.relu(x @ params["w1"] + params["b1"])
    h2 = jax.nn.relu(h1 @ params["w2"] + params["b2"])
    return h2 @ params["w3"] + params["b3"]


def reference_forward_bf16(state, action, kparams):
    """Exactly the kernel's math (bf16 operands, f32 accumulate) in plain JAX."""
    s = state.astype(jnp.bfloat16)
    a = action.astype(jnp.bfloat16)
    h1 = (jnp.dot(s, kparams["w1s"], preferred_element_type=jnp.float32)
          + jnp.dot(a, kparams["w1a"], preferred_element_type=jnp.float32)
          + kparams["b1"])
    h1 = jnp.maximum(h1, 0.0).astype(jnp.bfloat16)
    h2 = jnp.dot(h1, kparams["w2"], preferred_element_type=jnp.float32) + kparams["b2"]
    h2 = jnp.maximum(h2, 0.0)
    return jnp.sum(h2 * kparams["w3"], axis=-1, keepdims=True) + kparams["b3"]


if __name__ == "__main__":
    # Small shapes consistent with the module's forward.
    B, state_dims, action_dims = 8, 8, 4
    fc1_dims, fc2_dims = 32, 32

    key = jax.random.PRNGKey(0)
    k_params, k_state, k_action = jax.random.split(key, 3)

    params = init_params(k_params, state_dims, action_dims, fc1_dims, fc2_dims)
    kparams = prepare_kernel_params(params, state_dims, action_dims)

    state = jax.random.normal(k_state, (B, state_dims), jnp.float32)
    action = jax.random.normal(k_action, (B, action_dims), jnp.float32)

    q = jax.block_until_ready(critic_forward(state, action, kparams))
    assert q.shape == (B, 1), q.shape

    # Tight check vs a reference that mirrors the kernel's precision choices.
    q_bf16 = reference_forward_bf16(state, action, kparams)
    assert jnp.allclose(q, q_bf16, atol=1e-3, rtol=1e-3), "mismatch vs bf16-consistent reference"

    # Fidelity to the module's f32 semantics (bf16 matmul operands, f32 accumulate).
    q_f32 = reference_forward_f32(state, action, params)
    max_err = float(jnp.max(jnp.abs(q - q_f32)))
    assert max_err < 5e-2, f"too far from f32 module semantics: {max_err}"

    # Exercise the multi-step grid + ragged-tail path with a second batch size.
    B2 = 100
    k_s2, k_a2 = jax.random.split(jax.random.PRNGKey(1))
    state2 = jax.random.normal(k_s2, (B2, state_dims), jnp.float32)
    action2 = jax.random.normal(k_a2, (B2, action_dims), jnp.float32)
    q2 = jax.block_until_ready(critic_forward(state2, action2, kparams, tile_cap=64))
    assert q2.shape == (B2, 1), q2.shape
    q2_ref = reference_forward_bf16(state2, action2, kparams)
    assert jnp.allclose(q2, q2_ref, atol=1e-3, rtol=1e-3), "mismatch on multi-tile path"

    print("KERNEL_OK")
</pallas_src>

<mosaic_0001>
module attributes {stable_mosaic.version = 11 : i64} {
  func.func @critic_kernel(%arg0: i32, %arg1: memref<8x8xf32, #tpu.memory_space<vmem>>, %arg2: memref<8x4xf32, #tpu.memory_space<vmem>>, %arg3: memref<8x128xbf16, #tpu.memory_space<vmem>>, %arg4: memref<4x128xbf16, #tpu.memory_space<vmem>>, %arg5: memref<1x128xf32, #tpu.memory_space<vmem>>, %arg6: memref<128x128xbf16, #tpu.memory_space<vmem>>, %arg7: memref<1x128xf32, #tpu.memory_space<vmem>>, %arg8: memref<1x128xf32, #tpu.memory_space<vmem>>, %arg9: memref<1x1xf32, #tpu.memory_space<vmem>>, %arg10: memref<8x1xf32, #tpu.memory_space<vmem>>) attributes {dimension_semantics = [#tpu.dimension_semantics<parallel>], iteration_bounds = array<i64: 1>, scalar_prefetch = 0 : i64, scratch_operands = 0 : i64, tpu.core_type = #tpu.core_type<tc>, window_params = [{transform_indices = @transform_0, window_bounds = array<i64: 8, 8>}, {transform_indices = @transform_1, window_bounds = array<i64: 8, 4>}, {pipeline_mode = #tpu.pipeline_mode<synchronous>, transform_indices = @transform_2, window_bounds = array<i64: 8, 128>}, {pipeline_mode = #tpu.pipeline_mode<synchronous>, transform_indices = @transform_3, window_bounds = array<i64: 4, 128>}, {pipeline_mode = #tpu.pipeline_mode<synchronous>, transform_indices = @transform_4, window_bounds = array<i64: 1, 128>}, {pipeline_mode = #tpu.pipeline_mode<synchronous>, transform_indices = @transform_5, window_bounds = array<i64: 128, 128>}, {pipeline_mode = #tpu.pipeline_mode<synchronous>, transform_indices = @transform_6, window_bounds = array<i64: 1, 128>}, {pipeline_mode = #tpu.pipeline_mode<synchronous>, transform_indices = @transform_7, window_bounds = array<i64: 1, 128>}, {pipeline_mode = #tpu.pipeline_mode<synchronous>, transform_indices = @transform_8, window_bounds = array<i64: 1, 1>}, {transform_indices = @transform_9, window_bounds = array<i64: 8, 1>}]} {
    %c0 = arith.constant 0 : index
    %c0_0 = arith.constant 0 : index
    %0 = vector.load %arg1[%c0, %c0_0] : memref<8x8xf32, #tpu.memory_space<vmem>>, vector<8x8xf32>
    %1 = arith.truncf %0 : vector<8x8xf32> to vector<8x8xbf16>
    %c0_1 = arith.constant 0 : index
    %c0_2 = arith.constant 0 : index
    %2 = vector.load %arg2[%c0_1, %c0_2] : memref<8x4xf32, #tpu.memory_space<vmem>>, vector<8x4xf32>
    %3 = arith.truncf %2 : vector<8x4xf32> to vector<8x4xbf16>
    %c0_3 = arith.constant 0 : index
    %c0_4 = arith.constant 0 : index
    %4 = vector.load %arg3[%c0_3, %c0_4] : memref<8x128xbf16, #tpu.memory_space<vmem>>, vector<8x128xbf16>
    %cst = arith.constant dense<0.000000e+00> : vector<8x128xf32>
    %5 = tpu.matmul %1, %4, %cst {dimension_numbers = #tpu.dot_dimension_numbers<[1], [0], [0], [1], [0, 0, 1, 1], [], []>} : vector<8x8xbf16>, vector<8x128xbf16>, vector<8x128xf32> -> vector<8x128xf32>
    %c0_5 = arith.constant 0 : index
    %c0_6 = arith.constant 0 : index
    %6 = vector.load %arg4[%c0_5, %c0_6] : memref<4x128xbf16, #tpu.memory_space<vmem>>, vector<4x128xbf16>
    %cst_7 = arith.constant dense<0.000000e+00> : vector<8x128xf32>
    %7 = tpu.matmul %3, %6, %cst_7 {dimension_numbers = #tpu.dot_dimension_numbers<[1], [0], [0], [1], [0, 0, 1, 1], [], []>} : vector<8x4xbf16>, vector<4x128xbf16>, vector<8x128xf32> -> vector<8x128xf32>
    %8 = arith.addf %5, %7 : vector<8x128xf32>
    %c0_8 = arith.constant 0 : index
    %c0_9 = arith.constant 0 : index
    %9 = vector.load %arg5[%c0_8, %c0_9] : memref<1x128xf32, #tpu.memory_space<vmem>>, vector<1x128xf32>
    %10 = vector.broadcast %9 : vector<1x128xf32> to vector<8x128xf32>
    %11 = arith.addf %8, %10 : vector<8x128xf32>
    %cst_10 = arith.constant 0.000000e+00 : f32
    %12 = vector.broadcast %cst_10 : f32 to vector<8x128xf32>
    %13 = arith.maximumf %11, %12 : vector<8x128xf32>
    %14 = arith.truncf %13 : vector<8x128xf32> to vector<8x128xbf16>
    %c0_11 = arith.constant 0 : index
    %c0_12 = arith.constant 0 : index
    %15 = vector.load %arg6[%c0_11, %c0_12] : memref<128x128xbf16, #tpu.memory_space<vmem>>, vector<128x128xbf16>
    %cst_13 = arith.constant dense<0.000000e+00> : vector<8x128xf32>
    %16 = tpu.matmul %14, %15, %cst_13 {dimension_numbers = #tpu.dot_dimension_numbers<[1], [0], [0], [1], [0, 0, 1, 1], [], []>} : vector<8x128xbf16>, vector<128x128xbf16>, vector<8x128xf32> -> vector<8x128xf32>
    %c0_14 = arith.constant 0 : index
    %c0_15 = arith.constant 0 : index
    %17 = vector.load %arg7[%c0_14, %c0_15] : memref<1x128xf32, #tpu.memory_space<vmem>>, vector<1x128xf32>
    %18 = vector.broadcast %17 : vector<1x128xf32> to vector<8x128xf32>
    %19 = arith.addf %16, %18 : vector<8x128xf32>
    %cst_16 = arith.constant 0.000000e+00 : f32
    %20 = vector.broadcast %cst_16 : f32 to vector<8x128xf32>
    %21 = arith.maximumf %19, %20 : vector<8x128xf32>
    %c0_17 = arith.constant 0 : index
    %c0_18 = arith.constant 0 : index
    %22 = vector.load %arg8[%c0_17, %c0_18] : memref<1x128xf32, #tpu.memory_space<vmem>>, vector<1x128xf32>
    %23 = vector.broadcast %22 : vector<1x128xf32> to vector<8x128xf32>
    %24 = arith.mulf %21, %23 : vector<8x128xf32>
    %cst_19 = arith.constant dense<0.000000e+00> : vector<8xf32>
    %25 = vector.multi_reduction <add>, %24, %cst_19 [1] : vector<8x128xf32> to vector<8xf32>
    %26 = vector.shape_cast %25 : vector<8xf32> to vector<8x1xf32>
    %c0_20 = arith.constant 0 : index
    %c0_21 = arith.constant 0 : index
    %27 = vector.load %arg9[%c0_20, %c0_21] : memref<1x1xf32, #tpu.memory_space<vmem>>, vector<1x1xf32>
    %28 = vector.broadcast %27 : vector<1x1xf32> to vector<8x1xf32>
    %29 = arith.addf %26, %28 : vector<8x1xf32>
    %c0_22 = arith.constant 0 : index
    %c0_23 = arith.constant 0 : index
    %30 = vector.load %arg10[%c0_22, %c0_23] : memref<8x1xf32, #tpu.memory_space<vmem>>, vector<8x1xf32>
    tpu.vector_store %arg10[%c0_22, %c0_23], %29 {strides = array<i32>} : memref<8x1xf32, #tpu.memory_space<vmem>>, vector<8x1xf32>,
    return
  }
  func.func @transform_0(%arg0: i32) -> (i32, i32) {
    %c0_i32 = arith.constant 0 : i32
    %c0_i32_0 = arith.constant 0 : i32
    return %arg0, %c0_i32 : i32, i32
  }
  func.func @transform_1(%arg0: i32) -> (i32, i32) {
    %c0_i32 = arith.constant 0 : i32
    %c0_i32_0 = arith.constant 0 : i32
    return %arg0, %c0_i32 : i32, i32
  }
  func.func @transform_2(%arg0: i32) -> (i32, i32) {
    %c0_i32 = arith.constant 0 : i32
    %c0_i32_0 = arith.constant 0 : i32
    %c0_i32_1 = arith.constant 0 : i32
    return %c0_i32, %c0_i32_0 : i32, i32
  }
  func.func @transform_3(%arg0: i32) -> (i32, i32) {
    %c0_i32 = arith.constant 0 : i32
    %c0_i32_0 = arith.constant 0 : i32
    %c0_i32_1 = arith.constant 0 : i32
    return %c0_i32, %c0_i32_0 : i32, i32
  }
  func.func @transform_4(%arg0: i32) -> (i32, i32) {
    %c0_i32 = arith.constant 0 : i32
    %c0_i32_0 = arith.constant 0 : i32
    %c0_i32_1 = arith.constant 0 : i32
    return %c0_i32, %c0_i32_0 : i32, i32
  }
  func.func @transform_5(%arg0: i32) -> (i32, i32) {
    %c0_i32 = arith.constant 0 : i32
    %c0_i32_0 = arith.constant 0 : i32
    %c0_i32_1 = arith.constant 0 : i32
    return %c0_i32, %c0_i32_0 : i32, i32
  }
  func.func @transform_6(%arg0: i32) -> (i32, i32) {
    %c0_i32 = arith.constant 0 : i32
    %c0_i32_0 = arith.constant 0 : i32
    %c0_i32_1 = arith.constant 0 : i32
    return %c0_i32, %c0_i32_0 : i32, i32
  }
  func.func @transform_7(%arg0: i32) -> (i32, i32) {
    %c0_i32 = arith.constant 0 : i32
    %c0_i32_0 = arith.constant 0 : i32
    %c0_i32_1 = arith.constant 0 : i32
    return %c0_i32, %c0_i32_0 : i32, i32
  }
  func.func @transform_8(%arg0: i32) -> (i32, i32) {
    %c0_i32 = arith.constant 0 : i32
    %c0_i32_0 = arith.constant 0 : i32
    %c0_i32_1 = arith.constant 0 : i32
    return %c0_i32, %c0_i32_0 : i32, i32
  }
  func.func @transform_9(%arg0: i32) -> (i32, i32) {
    %c0_i32 = arith.constant 0 : i32
    %c0_i32_0 = arith.constant 0 : i32
    return %arg0, %c0_i32 : i32, i32
  }
}

</mosaic_0001>

<bundles_post_ra>
// kernel: critic_forward.1
= control target key start
LH: loop header
LB: loop body
LE: loop exit
PB: predicated region body
PF: predicated region fallthrough
CT: control target
= control target key end

     0   :  { %s491_s0 = inlined_call_operand.vmem [shape: f32[8,8], index: 0, kind: input, shape index: {}]   ;;  %s492_s1 = inlined_call_operand.vmem [shape: f32[8,4], index: 1, kind: input, shape index: {}]   ;;  %s493_s2 = inlined_call_operand.vmem [shape: bf16[8,128], index: 2, kind: input, shape index: {}]   ;;  %s494_s3 = inlined_call_operand.vmem [shape: bf16[4,128], index: 3, kind: input, shape index: {}]   ;;  %s495_s4 = inlined_call_operand.vmem [shape: f32[1,128], index: 4, kind: input, shape index: {}]   ;;  %s496_s5 = inlined_call_operand.hbm [shape: bf16[128,128], index: 5, kind: input, shape index: {}]   ;;  %s497_s6 = inlined_call_operand.vmem [shape: f32[1,128], index: 6, kind: input, shape index: {}]   ;;  %s498_s7 = inlined_call_operand.vmem [shape: f32[1,128], index: 7, kind: input, shape index: {}]   ;;  %s499_s8 = inlined_call_operand.<no memory space> [shape: f32[1,1], index: 8, kind: input, shape index: {}]   ;;  %s500_s9 = inlined_call_operand.vmem [shape: f32[8,1], index: 9, kind: output, shape index: {}]  }
   0x1   :  { %v14_v0 = vstv %s499_s8 }
   0x2   :  { %15 = vst [vmem:[#allocation2] sm:$0x1] %v14_v0 }
   0x3   :  { %16 = vsyncpa [#allocation4], 0  ;;  %s394_s11 = smov [#allocation3]   ;;  %s370_s15 = scalar_lea.hbm %s496_s5, 1024 }
   0x4   :  { %s32_s12 = sshll.u32 %s394_s11, 4  ;;  %p371_p0 = scmp.ne.s32.totalorder %s496_s5, %s370_s15  ;;  %s33_s12 = int_to_ptr.vmem [resolvable:$true] %s32_s12 }
   0x5   :  { %p374_p1 = scmp.lt.u32.totalorder %s370_s15, %s496_s5 }
   0x7   :  { %p376_p2 = pnand %p374_p1, %p371_p0 }
   0x9   :  { %379 = shalt.err (!%p376_p2)
}
   0xa   :  { %s380_s8 = scalar_lea.vmem %s33_s12, 1024  ;;  %p385_p4 = scmp.lt.s32.totalorder %s33_s12, %s33_s12 }
   0xb   :  { %p381_p3 = scmp.ne.s32.totalorder %s33_s12, %s380_s8  ;;  %p386_p5 = scmp.lt.s32.totalorder %s380_s8, %s380_s8 }
   0xd   :  { %p387_p6 = por %p386_p5, %p385_p4 }
   0xf   :  { %p388_p7 = pnand %p387_p6, %p381_p3 }
  0x11   :  { %391 = shalt.err (!%p388_p7)
}
  0x12   :  { %s395_s20 = smov 64   ;;  %s396_s21 = smov 4  }
  0x13   :  { %38 = dma.hbm_to_vmem [thread:$0]  %s496_s5, 1024, %s33_s12, [#allocation4], %s395_s20, %s395_s20, %s396_s21  }
  0x14   :  { %392 = dma.done.wait [#allocation4], 1024  }
  0x15   :  { %393 = vsyncadd [#allocation4], 4294966272  ;;  %v397_v1 = vmov 0.0   ;;  %vm398_vm0 = vmmov 0   ;;  %vm59_vm1 = vcmask 1041408   ;;  %v51_v3 = vld [vmem:[%s492_s1] sm:$0xff] }
  0x16   :  { %325 = vmatprep.subr.bf16.mxu1 %v397_v1  ;;  %327 = vmatprep.mubr.msk.bf16.mxu1 %vm398_vm0, %v397_v1  ;;  %v54_v2 = vld [vmem:[%s494_s3] sm:$0x3]  ;;  %vm107_vm2 = vcmask 1043456   ;;  %v52_v6 = vpack.c.bf16 %v51_v3, %v51_v3  ;;  %vm55_vm3 = vcmask 31744   ;;  %v363_v9 = vld [vmem:[#allocation3 + $0x8] sm:$0xff]   ;;  %v364_v11 = vld [vmem:[#allocation3 + $0x10] sm:$0xff]  }
  0x17   :  { %337 = vmatprep.subr.bf16.mxu0 %v397_v1  ;;  %353 = vmatprep.mubr.msk.bf16.mxu0 %vm398_vm0, %v397_v1  ;;  %v53_v4 = vld [vmem:[%s493_s2] sm:$0xf]  ;;  %v61_v5 = vsel %vm59_vm1, %v54_v2, 0  ;;  %vm103_vm4 = vcmask 64512   ;;  %v367_v15 = vld [vmem:[#allocation3 + $0x28] sm:$0xff]   ;;  %v368_v16 = vld [vmem:[#allocation3 + $0x30] sm:$0xff]  }
  0x18   :  { %v362_v7 = vld [vmem:[#allocation3] sm:$0xff]   ;;  %326 = vmatpush3.bf16.msra.mxu1 %v61_v5  ;;  %v109_v8 = vsel %vm107_vm2, %v53_v4, 0  ;;  %v365_v13 = vld [vmem:[#allocation3 + $0x18] sm:$0xff]   ;;  %vm291_vm5 = vcmask 7168  }
  0x19   :  { %331 = vmatprep.subr.bf16.mxu1 %v397_v1  ;;  %338 = vmatpush3.bf16.msra.mxu0 %v362_v7  ;;  %v49_v10 = vld [vmem:[%s491_s0] sm:$0xff] }
  0x1a   :  { %339 = vmatprep.subr.bf16.mxu0 %v397_v1  ;;  %v50_v12 = vpack.c.bf16 %v49_v10, %v49_v10  ;;  %v366_v14 = vld [vmem:[#allocation3 + $0x20] sm:$0xff]   ;;  %v369_v17 = vld [vmem:[#allocation3 + $0x38] sm:$0xff]  }
  0x1b   :  { %328 = vmatmul.mubr.msk.bf16.vlgmr.msra.gmra.mrb[0].mxu1 %vm55_vm3, %v52_v6  ;;  %v300_v23 = vld [vmem:[%s495_s4] ss:$0 sm:$0xff] }
  0x1c   :  { %332 = vmatpush3.bf16.msra.mxu1 %v109_v8  ;;  %333 = vmatprep.mubr.msk.bf16.mxu1 %vm398_vm0, %v397_v1  ;;  %v301_v31 = vld [vmem:[%s497_s6] ss:$0 sm:$0xff] }
  0x1d   :  { %340 = vmatpush3.bf16.msra.mxu0 %v363_v9  ;;  %v310_v36 = vld [vmem:[%s498_s7] ss:$0 sm:$0xff] }
  0x1e   :  { %341 = vmatprep.subr.bf16.mxu0 %v397_v1  ;;  %v311_v40 = vld [vmem:[#allocation2] ss:$0 sm:$0xff] }
  0x21   :  { %342 = vmatpush3.bf16.msra.mxu0 %v364_v11 }
  0x22   :  { %343 = vmatprep.subr.bf16.mxu0 %v397_v1 }
  0x23   :  { %334 = vmatmul.mubr.msk.bf16.vlgmr.msra.gmra.mrb[4].mxu1 %vm103_vm4, %v50_v12 }
  0x25   :  { %344 = vmatpush3.bf16.msra.mxu0 %v365_v13 }
  0x26   :  { %345 = vmatprep.subr.bf16.mxu0 %v397_v1 }
  0x29   :  { %346 = vmatpush3.bf16.msra.mxu0 %v366_v14 }
  0x2a   :  { %347 = vmatprep.subr.bf16.mxu0 %v397_v1 }
  0x2d   :  { %348 = vmatpush3.bf16.msra.mxu0 %v367_v15 }
  0x2e   :  { %349 = vmatprep.subr.bf16.mxu0 %v397_v1 }
  0x31   :  { %350 = vmatpush3.bf16.msra.mxu0 %v368_v16 }
  0x32   :  { %351 = vmatprep.subr.bf16.mxu0 %v397_v1 }
  0x35   :  { %352 = vmatpush3.bf16.msra.mxu0 %v369_v17 }
  0xee   :  { %v97_v18 = vpop.f32.mrb[0].mxu1 }
  0xef   :  { %v329_v19 = vpop.f32.mrb[1].mxu1 }
  0xf0   :  { %v100_v20 = vpop.f32.mrb[2].mxu1 }
  0xf1   :  { %v330_v21 = vpop.f32.mrb[3].mxu1 }
  0xf6   :  { %v145_v22 = vpop.f32.mrb[4].mxu1 }
  0xf7   :  { %v146_v24 = vadd.f32 %v145_v22, %v97_v18  ;;  %v335_v25 = vpop.f32.mrb[5].mxu1 }
  0xf8   :  { %v148_v26 = vpop.f32.mrb[6].mxu1 }
  0xf9   :  { %v158_v27 = vadd.f32 %v300_v23, %v146_v24  ;;  %v336_v28 = vpop.f32.mrb[7].mxu1 }
  0xfb   :  { %v159_v29 = vmax.f32 %v158_v27, 0.0 }
  0xfd   :  { %v160_v30 = vpack.c.bf16 %v159_v29, %v159_v29 }
  0xff   :  { %354 = vmatmul.mubr.bf16.vlgmr.msra.gmra.mrb[0].mxu0 %v160_v30 }
 0x1d2   :  { %v266_v32 = vpop.f32.mrb[0].mxu0 }
 0x1d3   :  { %v267_v33 = vadd.f32 %v301_v31, %v266_v32  ;;  %v355_v34 = vpop.f32.mrb[1].mxu0 }
 0x1d4   :  { %v269_v35 = vpop.f32.mrb[2].mxu0 }
 0x1d5   :  { %v272_v37 = vmax.f32 %v267_v33, 0.0  ;;  %v356_v38 = vpop.f32.mrb[3].mxu0 }
 0x1d7   :  { %v280_v39 = vmul.f32 %v310_v36, %v272_v37 }
 0x1d9   :  { %281 = vadd.xlane.f32.xlu0 %v280_v39 }
 0x266   :  { %v282_v41 = vpop.xlane.xlu0 %281 }
 0x267   :  { %v290_v42 = vadd.f32 %v311_v40, %v282_v41 }
 0x269   :  { %292 = vst.msk [vmem:[%s500_s9] sm:$0xff] %vm291_vm5, %v290_v42 }
 0x26a   :  { %297 = vsyncpa [#allocation4], 1 }

</bundles_post_ra>
